<compile_context>
chip_gen: v5e
topology: v5e:2x2
jax: 0.10.0
libtpu: 0.0.40
codegen_flags: <defaults>
</compile_context>

<pallas_src>
import functools

import jax
import jax.numpy as jnp
from jax.experimental import pallas as pl
from jax.experimental.pallas import tpu as pltpu


def _round_up(x, m):
    return ((x + m - 1) // m) * m


@functools.lru_cache(maxsize=1)
def _vmem_cap_bytes():
    """Generation-aware scoped-VMEM cap (~82% of physical, leaving headroom for
    Mosaic internal scratch): ~52 MiB on v7x (64 MiB VMEM), ~105 MiB on
    v5e/v6e (128 MiB). Conservative 48 MiB if the query is unavailable."""
    try:
        phys = int(pltpu.get_tpu_info().vmem_capacity_bytes)
        if phys > 0:
            return max((phys * 82) // 100, 16 << 20)
    except Exception:
        pass
    return 48 << 20


def mlp_kernel(x_ref, w1_ref, b1_ref, w2_ref, b2_ref, o_ref):
    # x tile: [tb, n_in]; resident weights: [n_in, n_hid_p], [n_hid_p, n_out].
    x = x_ref[...]
    h = jnp.dot(x, w1_ref[...], preferred_element_type=jnp.float32)
    h = jnp.maximum(h + b1_ref[...], 0.0)            # bias + ReLU, never leaves VMEM
    y = jnp.dot(h.astype(w2_ref.dtype), w2_ref[...],
                preferred_element_type=jnp.float32) + b2_ref[...]
    o_ref[...] = y.astype(o_ref.dtype)


def prepare_params(w1, b1, w2, b2, *, compute_dtype=None):
    """One-time parameter prep (hoisted out of the per-call path): pad the
    hidden dim to a multiple of 128 (lane-dense VMEM intermediate; the zero
    cols/rows/bias entries are mathematically inert) and cast to compute_dtype.
    Weights are stored as y = x @ W + b (transposed vs. torch.nn.Linear)."""
    n_in, n_hidden = w1.shape
    n_out = w2.shape[1]
    dt = compute_dtype if compute_dtype is not None else w1.dtype
    n_hid_p = _round_up(n_hidden, 128)
    w1_p = jnp.zeros((n_in, n_hid_p), dt).at[:, :n_hidden].set(w1.astype(dt))
    b1_p = jnp.zeros((1, n_hid_p), dt).at[:, :n_hidden].set(
        b1.reshape(1, -1).astype(dt))
    w2_p = jnp.zeros((n_hid_p, n_out), dt).at[:n_hidden, :].set(w2.astype(dt))
    b2_p = b2.reshape(1, -1).astype(dt)
    return w1_p, b1_p, w2_p, b2_p


_SINGLE_BUFFER_WEIGHTS = True  # flipped off at runtime if pl.Buffered(1) is rejected


def mlp_forward(x, params, *, tile_b=1024):
    """x: [B, n_in] -> [B, n_out], params from prepare_params()."""
    global _SINGLE_BUFFER_WEIGHTS
    w1_p, b1_p, w2_p, b2_p = params
    B, n_in = x.shape
    assert w1_p.shape[0] == n_in
    n_hid_p = w1_p.shape[1]
    n_out = w2_p.shape[1]

    out_dtype = x.dtype
    cdt = w1_p.dtype
    x_c = x if x.dtype == cdt else x.astype(cdt)

    # Batch tile: sublane-aligned, big enough to amortize per-step overhead;
    # split large single-tile batches into >=2 steps so both v7x TCs get work.
    align = 16 if cdt == jnp.dtype(jnp.bfloat16) else 8
    tb = _round_up(min(tile_b, B), align)
    if _round_up(B, tb) == tb and tb >= 256:
        tb = _round_up(tb // 2, align)
    B_p = _round_up(B, tb)
    grid = (B_p // tb,)

    if B_p != B:  # pad only the batch axis; feature dims stay unpadded in HBM
        x_c = jnp.zeros((B_p, n_in), cdt).at[:B].set(x_c)

    # VMEM budget: double-buffered x/out tiles + resident weights (counted at 2
    # buffers as an upper bound in case single-buffering is unavailable) + f32
    # intermediates; ~25% headroom, clamped to a generation-aware cap.
    isz = jnp.dtype(cdt).itemsize
    vmem_needed = (
        2 * tb * (n_in + n_out) * isz
        + 2 * (n_in * n_hid_p + n_hid_p * n_out + n_hid_p + n_out) * isz
        + tb * (n_hid_p + n_out) * 4
    )
    vmem_limit = int(min(max(vmem_needed * 5 // 4, 16 << 20), _vmem_cap_bytes()))

    def resident_spec(shape, single_buffer):
        # Constant index_map -> data DMA'd once; single-buffer to halve VMEM.
        kwargs = {"pipeline_mode": pl.Buffered(1)} if single_buffer else {}
        return pl.BlockSpec(shape, lambda i: (0, 0), **kwargs)

    def run(single_buffer):
        return pl.pallas_call(
            mlp_kernel,
            out_shape=jax.ShapeDtypeStruct((B_p, n_out), out_dtype),
            grid=grid,
            in_specs=[
                pl.BlockSpec((tb, n_in), lambda i: (i, 0)),   # pipelined batch tile
                resident_spec((n_in, n_hid_p), single_buffer),
                resident_spec((1, n_hid_p), single_buffer),
                resident_spec((n_hid_p, n_out), single_buffer),
                resident_spec((1, n_out), single_buffer),
            ],
            out_specs=pl.BlockSpec((tb, n_out), lambda i: (i, 0)),
            compiler_params=pltpu.CompilerParams(
                dimension_semantics=("parallel",),
                vmem_limit_bytes=vmem_limit,
            ),
        )(x_c, w1_p, b1_p, w2_p, b2_p)

    if _SINGLE_BUFFER_WEIGHTS:
        try:
            out = run(True)
        except Exception:  # pl.Buffered(1) unsupported in this JAX build
            _SINGLE_BUFFER_WEIGHTS = False
            out = run(False)
    else:
        out = run(False)

    return out if B_p == B else out[:B]


def reference_forward(x, w1, b1, w2, b2):
    h = jnp.maximum(x @ w1 + b1.reshape(1, -1), 0.0)
    return h @ w2 + b2.reshape(1, -1)


if __name__ == "__main__":
    # Shapes consistent with the module: batch=8, n_input=32, n_hidden=64, n_output=16
    B, n_input, n_hidden, n_output = 8, 32, 64, 16

    key = jax.random.PRNGKey(0)
    kx, kw1, kb1, kw2, kb2 = jax.random.split(key, 5)

    x = jax.random.normal(kx, (B, n_input), dtype=jnp.float32)

    # torch.nn.Linear-style uniform init; weights stored as (in, out).
    bound1 = 1.0 / (n_input ** 0.5)
    w1 = jax.random.uniform(kw1, (n_input, n_hidden), jnp.float32, -bound1, bound1)
    b1 = jax.random.uniform(kb1, (n_hidden,), jnp.float32, -bound1, bound1)
    bound2 = 1.0 / (n_hidden ** 0.5)
    w2 = jax.random.uniform(kw2, (n_hidden, n_output), jnp.float32, -bound2, bound2)
    b2 = jax.random.uniform(kb2, (n_output,), jnp.float32, -bound2, bound2)

    params = prepare_params(w1, b1, w2, b2)  # one-time prep, f32

    # Small batch (single grid step).
    y = mlp_forward(x, params)
    jax.block_until_ready(y)
    y_ref = reference_forward(x, w1, b1, w2, b2)
    assert y.shape == (B, n_output)
    assert jnp.allclose(y, y_ref, atol=1e-5, rtol=1e-5), "small-batch mismatch"

    # Large batch: multi-step "parallel" grid (>=2 steps -> both v7x TCs).
    B2 = 2048
    x2 = jax.random.normal(jax.random.PRNGKey(1), (B2, n_input), dtype=jnp.float32)
    y2 = mlp_forward(x2, params)
    jax.block_until_ready(y2)
    assert y2.shape == (B2, n_output)
    assert jnp.allclose(y2, reference_forward(x2, w1, b1, w2, b2),
                        atol=1e-5, rtol=1e-5), "large-batch mismatch"

    # Ragged batch: exercises batch-only padding + slice-back.
    B3 = 1000
    x3 = jax.random.normal(jax.random.PRNGKey(2), (B3, n_input), dtype=jnp.float32)
    y3 = mlp_forward(x3, params)
    jax.block_until_ready(y3)
    assert y3.shape == (B3, n_output)
    assert jnp.allclose(y3, reference_forward(x3, w1, b1, w2, b2),
                        atol=1e-5, rtol=1e-5), "ragged-batch mismatch"

    # Optional bf16 compute path (f32 MXU accumulation), looser tolerance.
    params_bf16 = prepare_params(w1, b1, w2, b2, compute_dtype=jnp.bfloat16)
    y_bf = mlp_forward(x2, params_bf16)
    jax.block_until_ready(y_bf)
    assert y_bf.shape == (B2, n_output)
    assert jnp.allclose(y_bf.astype(jnp.float32),
                        reference_forward(x2, w1, b1, w2, b2),
                        atol=1e-1, rtol=5e-2), "bf16 path mismatch"

    print("KERNEL_OK")
</pallas_src>

<mosaic_0001>
module attributes {stable_mosaic.version = 11 : i64} {
  func.func @mlp_kernel(%arg0: i32, %arg1: memref<8x32xf32, #tpu.memory_space<vmem>>, %arg2: memref<32x128xf32, #tpu.memory_space<vmem>>, %arg3: memref<1x128xf32, #tpu.memory_space<vmem>>, %arg4: memref<128x16xf32, #tpu.memory_space<vmem>>, %arg5: memref<1x16xf32, #tpu.memory_space<vmem>>, %arg6: memref<8x16xf32, #tpu.memory_space<vmem>>) attributes {dimension_semantics = [#tpu.dimension_semantics<parallel>], iteration_bounds = array<i64: 1>, scalar_prefetch = 0 : i64, scratch_operands = 0 : i64, tpu.core_type = #tpu.core_type<tc>, window_params = [{transform_indices = @transform_0, window_bounds = array<i64: 8, 32>}, {pipeline_mode = #tpu.pipeline_mode<synchronous>, transform_indices = @transform_1, window_bounds = array<i64: 32, 128>}, {pipeline_mode = #tpu.pipeline_mode<synchronous>, transform_indices = @transform_2, window_bounds = array<i64: 1, 128>}, {pipeline_mode = #tpu.pipeline_mode<synchronous>, transform_indices = @transform_3, window_bounds = array<i64: 128, 16>}, {pipeline_mode = #tpu.pipeline_mode<synchronous>, transform_indices = @transform_4, window_bounds = array<i64: 1, 16>}, {transform_indices = @transform_5, window_bounds = array<i64: 8, 16>}]} {
    %c0 = arith.constant 0 : index
    %c0_0 = arith.constant 0 : index
    %0 = vector.load %arg1[%c0, %c0_0] : memref<8x32xf32, #tpu.memory_space<vmem>>, vector<8x32xf32>
    %c0_1 = arith.constant 0 : index
    %c0_2 = arith.constant 0 : index
    %1 = vector.load %arg2[%c0_1, %c0_2] : memref<32x128xf32, #tpu.memory_space<vmem>>, vector<32x128xf32>
    %cst = arith.constant dense<0.000000e+00> : vector<8x128xf32>
    %2 = tpu.matmul %0, %1, %cst {dimension_numbers = #tpu.dot_dimension_numbers<[1], [0], [0], [1], [0, 0, 1, 1], [], []>} : vector<8x32xf32>, vector<32x128xf32>, vector<8x128xf32> -> vector<8x128xf32>
    %c0_3 = arith.constant 0 : index
    %c0_4 = arith.constant 0 : index
    %3 = vector.load %arg3[%c0_3, %c0_4] : memref<1x128xf32, #tpu.memory_space<vmem>>, vector<1x128xf32>
    %4 = vector.broadcast %3 : vector<1x128xf32> to vector<8x128xf32>
    %5 = arith.addf %2, %4 : vector<8x128xf32>
    %cst_5 = arith.constant 0.000000e+00 : f32
    %6 = vector.broadcast %cst_5 : f32 to vector<8x128xf32>
    %7 = arith.maximumf %5, %6 : vector<8x128xf32>
    %c0_6 = arith.constant 0 : index
    %c0_7 = arith.constant 0 : index
    %8 = vector.load %arg4[%c0_6, %c0_7] : memref<128x16xf32, #tpu.memory_space<vmem>>, vector<128x16xf32>
    %cst_8 = arith.constant dense<0.000000e+00> : vector<8x16xf32>
    %9 = tpu.matmul %7, %8, %cst_8 {dimension_numbers = #tpu.dot_dimension_numbers<[1], [0], [0], [1], [0, 0, 1, 1], [], []>} : vector<8x128xf32>, vector<128x16xf32>, vector<8x16xf32> -> vector<8x16xf32>
    %c0_9 = arith.constant 0 : index
    %c0_10 = arith.constant 0 : index
    %10 = vector.load %arg5[%c0_9, %c0_10] : memref<1x16xf32, #tpu.memory_space<vmem>>, vector<1x16xf32>
    %11 = vector.broadcast %10 : vector<1x16xf32> to vector<8x16xf32>
    %12 = arith.addf %9, %11 : vector<8x16xf32>
    %c0_11 = arith.constant 0 : index
    %c0_12 = arith.constant 0 : index
    %13 = vector.load %arg6[%c0_11, %c0_12] : memref<8x16xf32, #tpu.memory_space<vmem>>, vector<8x16xf32>
    tpu.vector_store %arg6[%c0_11, %c0_12], %12 {strides = array<i32>} : memref<8x16xf32, #tpu.memory_space<vmem>>, vector<8x16xf32>,
    return
  }
  func.func @transform_0(%arg0: i32) -> (i32, i32) {
    %c0_i32 = arith.constant 0 : i32
    %c0_i32_0 = arith.constant 0 : i32
    return %arg0, %c0_i32 : i32, i32
  }
  func.func @transform_1(%arg0: i32) -> (i32, i32) {
    %c0_i32 = arith.constant 0 : i32
    %c0_i32_0 = arith.constant 0 : i32
    %c0_i32_1 = arith.constant 0 : i32
    return %c0_i32, %c0_i32_0 : i32, i32
  }
  func.func @transform_2(%arg0: i32) -> (i32, i32) {
    %c0_i32 = arith.constant 0 : i32
    %c0_i32_0 = arith.constant 0 : i32
    %c0_i32_1 = arith.constant 0 : i32
    return %c0_i32, %c0_i32_0 : i32, i32
  }
  func.func @transform_3(%arg0: i32) -> (i32, i32) {
    %c0_i32 = arith.constant 0 : i32
    %c0_i32_0 = arith.constant 0 : i32
    %c0_i32_1 = arith.constant 0 : i32
    return %c0_i32, %c0_i32_0 : i32, i32
  }
  func.func @transform_4(%arg0: i32) -> (i32, i32) {
    %c0_i32 = arith.constant 0 : i32
    %c0_i32_0 = arith.constant 0 : i32
    %c0_i32_1 = arith.constant 0 : i32
    return %c0_i32, %c0_i32_0 : i32, i32
  }
  func.func @transform_5(%arg0: i32) -> (i32, i32) {
    %c0_i32 = arith.constant 0 : i32
    %c0_i32_0 = arith.constant 0 : i32
    return %arg0, %c0_i32 : i32, i32
  }
}

module attributes {stable_mosaic.version = 11 : i64} {
  func.func @mlp_kernel(%arg0: i32, %arg1: memref<8x32xf32, #tpu.memory_space<vmem>>, %arg2: memref<32x128xf32, #tpu.memory_space<vmem>>, %arg3: memref<1x128xf32, #tpu.memory_space<vmem>>, %arg4: memref<128x16xf32, #tpu.memory_space<vmem>>, %arg5: memref<1x16xf32, #tpu.memory_space<vmem>>, %arg6: memref<8x16xf32, #tpu.memory_space<vmem>>) attributes {dimension_semantics = [#tpu.dimension_semantics<parallel>], iteration_bounds = array<i64: 1>, scalar_prefetch = 0 : i64, scratch_operands = 0 : i64, tpu.core_type = #tpu.core_type<tc>, window_params = [{transform_indices = @transform_0, window_bounds = array<i64: 8, 32>}, {pipeline_mode = #tpu.pipeline_mode<synchronous>, transform_indices = @transform_1, window_bounds = array<i64: 32, 128>}, {pipeline_mode = #tpu.pipeline_mode<synchronous>, transform_indices = @transform_2, window_bounds = array<i64: 1, 128>}, {pipeline_mode = #tpu.pipeline_mode<synchronous>, transform_indices = @transform_3, window_bounds = array<i64: 128, 16>}, {pipeline_mode = #tpu.pipeline_mode<synchronous>, transform_indices = @transform_4, window_bounds = array<i64: 1, 16>}, {transform_indices = @transform_5, window_bounds = array<i64: 8, 16>}]} {
    %c0 = arith.constant 0 : index
    %c0_0 = arith.constant 0 : index
    %0 = vector.load %arg1[%c0, %c0_0] : memref<8x32xf32, #tpu.memory_space<vmem>>, vector<8x32xf32>
    %c0_1 = arith.constant 0 : index
    %c0_2 = arith.constant 0 : index
    %1 = vector.load %arg2[%c0_1, %c0_2] : memref<32x128xf32, #tpu.memory_space<vmem>>, vector<32x128xf32>
    %cst = arith.constant dense<0.000000e+00> : vector<8x128xf32>
    %2 = tpu.matmul %0, %1, %cst {dimension_numbers = #tpu.dot_dimension_numbers<[1], [0], [0], [1], [0, 0, 1, 1], [], []>} : vector<8x32xf32>, vector<32x128xf32>, vector<8x128xf32> -> vector<8x128xf32>
    %c0_3 = arith.constant 0 : index
    %c0_4 = arith.constant 0 : index
    %3 = vector.load %arg3[%c0_3, %c0_4] : memref<1x128xf32, #tpu.memory_space<vmem>>, vector<1x128xf32>
    %4 = vector.broadcast %3 : vector<1x128xf32> to vector<8x128xf32>
    %5 = arith.addf %2, %4 : vector<8x128xf32>
    %cst_5 = arith.constant 0.000000e+00 : f32
    %6 = vector.broadcast %cst_5 : f32 to vector<8x128xf32>
    %7 = arith.maximumf %5, %6 : vector<8x128xf32>
    %c0_6 = arith.constant 0 : index
    %c0_7 = arith.constant 0 : index
    %8 = vector.load %arg4[%c0_6, %c0_7] : memref<128x16xf32, #tpu.memory_space<vmem>>, vector<128x16xf32>
    %cst_8 = arith.constant dense<0.000000e+00> : vector<8x16xf32>
    %9 = tpu.matmul %7, %8, %cst_8 {dimension_numbers = #tpu.dot_dimension_numbers<[1], [0], [0], [1], [0, 0, 1, 1], [], []>} : vector<8x128xf32>, vector<128x16xf32>, vector<8x16xf32> -> vector<8x16xf32>
    %c0_9 = arith.constant 0 : index
    %c0_10 = arith.constant 0 : index
    %10 = vector.load %arg5[%c0_9, %c0_10] : memref<1x16xf32, #tpu.memory_space<vmem>>, vector<1x16xf32>
    %11 = vector.broadcast %10 : vector<1x16xf32> to vector<8x16xf32>
    %12 = arith.addf %9, %11 : vector<8x16xf32>
    %c0_11 = arith.constant 0 : index
    %c0_12 = arith.constant 0 : index
    %13 = vector.load %arg6[%c0_11, %c0_12] : memref<8x16xf32, #tpu.memory_space<vmem>>, vector<8x16xf32>
    tpu.vector_store %arg6[%c0_11, %c0_12], %12 {strides = array<i32>} : memref<8x16xf32, #tpu.memory_space<vmem>>, vector<8x16xf32>,
    return
  }
  func.func @transform_0(%arg0: i32) -> (i32, i32) {
    %c0_i32 = arith.constant 0 : i32
    %c0_i32_0 = arith.constant 0 : i32
    return %arg0, %c0_i32 : i32, i32
  }
  func.func @transform_1(%arg0: i32) -> (i32, i32) {
    %c0_i32 = arith.constant 0 : i32
    %c0_i32_0 = arith.constant 0 : i32
    %c0_i32_1 = arith.constant 0 : i32
    return %c0_i32, %c0_i32_0 : i32, i32
  }
  func.func @transform_2(%arg0: i32) -> (i32, i32) {
    %c0_i32 = arith.constant 0 : i32
    %c0_i32_0 = arith.constant 0 : i32
    %c0_i32_1 = arith.constant 0 : i32
    return %c0_i32, %c0_i32_0 : i32, i32
  }
  func.func @transform_3(%arg0: i32) -> (i32, i32) {
    %c0_i32 = arith.constant 0 : i32
    %c0_i32_0 = arith.constant 0 : i32
    %c0_i32_1 = arith.constant 0 : i32
    return %c0_i32, %c0_i32_0 : i32, i32
  }
  func.func @transform_4(%arg0: i32) -> (i32, i32) {
    %c0_i32 = arith.constant 0 : i32
    %c0_i32_0 = arith.constant 0 : i32
    %c0_i32_1 = arith.constant 0 : i32
    return %c0_i32, %c0_i32_0 : i32, i32
  }
  func.func @transform_5(%arg0: i32) -> (i32, i32) {
    %c0_i32 = arith.constant 0 : i32
    %c0_i32_0 = arith.constant 0 : i32
    return %arg0, %c0_i32 : i32, i32
  }
}

</mosaic_0001>

<bundles_post_ra>
// kernel: tpu_custom_call.1
= control target key start
LH: loop header
LB: loop body
LE: loop exit
PB: predicated region body
PF: predicated region fallthrough
CT: control target
= control target key end

     0   :  { %vm30_vm0 = vcmask 261120   ;;  %s246_s0 = inlined_call_operand.vmem [shape: f32[8,32], index: 0, kind: input, shape index: {}]   ;;  %s247_s1 = inlined_call_operand.vmem [shape: f32[32,128], index: 1, kind: input, shape index: {}]   ;;  %s248_s2 = inlined_call_operand.vmem [shape: f32[1,128], index: 2, kind: input, shape index: {}]   ;;  %s249_s3 = inlined_call_operand.vmem [shape: f32[128,16], index: 3, kind: input, shape index: {}]   ;;  %s250_s4 = inlined_call_operand.vmem [shape: f32[1,16], index: 4, kind: input, shape index: {}]   ;;  %s251_s5 = inlined_call_operand.hbm [shape: f32[8,16], index: 5, kind: output, shape index: {}]  }
   0x1   :  { %v25_v0 = vld [vmem:[%s247_s1 + $0x18] sm:$0xff]  ;;  %v24_v1 = vld [vmem:[%s247_s1 + $0x10] sm:$0xff]  ;;  %v23_v3 = vld [vmem:[%s247_s1 + $0x8] sm:$0xff] }
   0x2   :  { %46 = vmatpush.msra.mxu0 %v25_v0  ;;  %v70_v2 = vld [vmem:[%s249_s3 + $0x78] sm:$0xff]  ;;  %v69_v4 = vld [vmem:[%s249_s3 + $0x70] sm:$0xff]  ;;  %v68_v5 = vld [vmem:[%s249_s3 + $0x68] sm:$0xff] }
   0x3   :  { %75 = vmatpush.msra.mxu1 %v70_v2  ;;  %v22_v6 = vld [vmem:[%s247_s1] sm:$0xff]  ;;  %v66_v9 = vld [vmem:[%s249_s3 + $0x58] sm:$0xff] }
   0x4   :  { %47 = vmatpush.msra.mxu0 %v24_v1  ;;  %v21_v7 = vld [vmem:[%s246_s0] sm:$0xff] }
   0x5   :  { %76 = vmatpush.msra.mxu1 %v69_v4  ;;  %v67_v8 = vld [vmem:[%s249_s3 + $0x60] sm:$0xff] }
   0x6   :  { %48 = vmatpush.msra.mxu0 %v23_v3 }
   0x7   :  { %77 = vmatpush.msra.mxu1 %v68_v5 }
   0x8   :  { %49 = vmatpush.msra.mxu0 %v22_v6 }
   0x9   :  { %10 = vsyncpa [#allocation3], 0  ;;  %113 = vmatmul.msk.f32.vlgmr.msra.gmra.mxu0 %vm30_vm0, %v21_v7  ;;  %78 = vmatpush.msra.mxu1 %v67_v8  ;;  %v65_v10 = vld [vmem:[%s249_s3 + $0x50] sm:$0xff]  ;;  %v64_v11 = vld [vmem:[%s249_s3 + $0x48] sm:$0xff]  ;;  %s143_s12 = smov [#allocation2]   ;;  %s104_s14 = sshll.u32 %s251_s5, 4  ;;  %s105_s14 = int_to_ptr.hbm [resolvable:$true] %s104_s14 }
   0xa   :  { %v63_v12 = vld [vmem:[%s249_s3 + $0x40] sm:$0xff]  ;;  %v62_v13 = vld [vmem:[%s249_s3 + $0x38] sm:$0xff]  ;;  %v61_v14 = vld [vmem:[%s249_s3 + $0x30] sm:$0xff]  ;;  %s102_s1 = sshll.u32 %s143_s12, 4  ;;  %vm95_vm1 = vcmask 130048   ;;  %s103_s1 = int_to_ptr.vmem [resolvable:$true] %s102_s1 }
   0xb   :  { %79 = vmatpush.msra.mxu1 %v66_v9  ;;  %v60_v15 = vld [vmem:[%s249_s3 + $0x28] sm:$0xff]  ;;  %v59_v16 = vld [vmem:[%s249_s3 + $0x20] sm:$0xff]  ;;  %v58_v17 = vld [vmem:[%s249_s3 + $0x18] sm:$0xff] }
   0xc   :  { %v57_v18 = vld [vmem:[%s249_s3 + $0x10] sm:$0xff]  ;;  %v56_v19 = vld [vmem:[%s249_s3 + $0x8] sm:$0xff]  ;;  %v55_v20 = vld [vmem:[%s249_s3] sm:$0xff] }
   0xd   :  { %80 = vmatpush.msra.mxu1 %v65_v10  ;;  %v115_v21 = vld [vmem:[%s248_s2] ss:$0 sm:$0xff] }
   0xe   :  { %v116_v25 = vld [vmem:[%s250_s4] ss:$0 sm:$0xff] }
   0xf   :  { %81 = vmatpush.msra.mxu1 %v64_v11 }
  0x11   :  { %82 = vmatpush.msra.mxu1 %v63_v12 }
  0x13   :  { %83 = vmatpush.msra.mxu1 %v62_v13 }
  0x15   :  { %84 = vmatpush.msra.mxu1 %v61_v14 }
  0x17   :  { %85 = vmatpush.msra.mxu1 %v60_v15 }
  0x19   :  { %86 = vmatpush.msra.mxu1 %v59_v16 }
  0x1b   :  { %87 = vmatpush.msra.mxu1 %v58_v17 }
  0x1d   :  { %88 = vmatpush.msra.mxu1 %v57_v18 }
  0x1f   :  { %89 = vmatpush.msra.mxu1 %v56_v19 }
  0x21   :  { %90 = vmatpush.msra.mxu1 %v55_v20 }
  0x86   :  { %v51_v22 = vpop.f32.mrf.mxu0 }
  0x87   :  { %v52_v23 = vadd.f32 %v115_v21, %v51_v22 }
  0x89   :  { %v54_v24 = vmax.f32 %v52_v23, 0.0 }
  0x8b   :  { %91 = vmatmul.f32.vlgmr.msra.gmra.mxu1 %v54_v24 }
 0x108   :  { %v92_v26 = vpop.f32.mrf.mxu1 }
 0x109   :  { %v93_v27 = vadd.f32 %v116_v25, %v92_v26 }
 0x10b   :  { %96 = vst.msk [vmem:[#allocation2] sm:$0xff] %vm95_vm1, %v93_v27 }
 0x10c   :  { %107 = dma.vmem_to_hbm [thread:$0]  %s103_s1, 128, %s105_s14, [#allocation3]  }
 0x10d   :  { %141 = dma.done.wait [#allocation3], 128  }
 0x10e   :  { %142 = vsyncadd [#allocation3], 4294967168 }
 0x10f   :  { %112 = vsyncpa [#allocation3], 1 }

// kernel: tpu_custom_call.1
= control target key start
LH: loop header
LB: loop body
LE: loop exit
PB: predicated region body
PF: predicated region fallthrough
CT: control target
= control target key end

     0   :  { %vm30_vm0 = vcmask 261120   ;;  %s246_s0 = inlined_call_operand.vmem [shape: f32[8,32], index: 0, kind: input, shape index: {}]   ;;  %s247_s1 = inlined_call_operand.vmem [shape: f32[32,128], index: 1, kind: input, shape index: {}]   ;;  %s248_s2 = inlined_call_operand.vmem [shape: f32[1,128], index: 2, kind: input, shape index: {}]   ;;  %s249_s3 = inlined_call_operand.vmem [shape: f32[128,16], index: 3, kind: input, shape index: {}]   ;;  %s250_s4 = inlined_call_operand.vmem [shape: f32[1,16], index: 4, kind: input, shape index: {}]   ;;  %s251_s5 = inlined_call_operand.hbm [shape: f32[8,16], index: 5, kind: output, shape index: {}]  }
   0x1   :  { %v25_v0 = vld [vmem:[%s247_s1 + $0x18] sm:$0xff]  ;;  %v24_v1 = vld [vmem:[%s247_s1 + $0x10] sm:$0xff]  ;;  %v23_v3 = vld [vmem:[%s247_s1 + $0x8] sm:$0xff] }
   0x2   :  { %46 = vmatpush.msra.mxu0 %v25_v0  ;;  %v70_v2 = vld [vmem:[%s249_s3 + $0x78] sm:$0xff]  ;;  %v69_v4 = vld [vmem:[%s249_s3 + $0x70] sm:$0xff]  ;;  %v68_v5 = vld [vmem:[%s249_s3 + $0x68] sm:$0xff] }
   0x3   :  { %75 = vmatpush.msra.mxu1 %v70_v2  ;;  %v22_v6 = vld [vmem:[%s247_s1] sm:$0xff]  ;;  %v66_v9 = vld [vmem:[%s249_s3 + $0x58] sm:$0xff] }
   0x4   :  { %47 = vmatpush.msra.mxu0 %v24_v1  ;;  %v21_v7 = vld [vmem:[%s246_s0] sm:$0xff] }
   0x5   :  { %76 = vmatpush.msra.mxu1 %v69_v4  ;;  %v67_v8 = vld [vmem:[%s249_s3 + $0x60] sm:$0xff] }
   0x6   :  { %48 = vmatpush.msra.mxu0 %v23_v3 }
   0x7   :  { %77 = vmatpush.msra.mxu1 %v68_v5 }
   0x8   :  { %49 = vmatpush.msra.mxu0 %v22_v6 }
   0x9   :  { %10 = vsyncpa [#allocation3], 0  ;;  %113 = vmatmul.msk.f32.vlgmr.msra.gmra.mxu0 %vm30_vm0, %v21_v7  ;;  %78 = vmatpush.msra.mxu1 %v67_v8  ;;  %v65_v10 = vld [vmem:[%s249_s3 + $0x50] sm:$0xff]  ;;  %v64_v11 = vld [vmem:[%s249_s3 + $0x48] sm:$0xff]  ;;  %s143_s12 = smov [#allocation2]   ;;  %s104_s14 = sshll.u32 %s251_s5, 4  ;;  %s105_s14 = int_to_ptr.hbm [resolvable:$true] %s104_s14 }
   0xa   :  { %v63_v12 = vld [vmem:[%s249_s3 + $0x40] sm:$0xff]  ;;  %v62_v13 = vld [vmem:[%s249_s3 + $0x38] sm:$0xff]  ;;  %v61_v14 = vld [vmem:[%s249_s3 + $0x30] sm:$0xff]  ;;  %s102_s1 = sshll.u32 %s143_s12, 4  ;;  %vm95_vm1 = vcmask 130048   ;;  %s103_s1 = int_to_ptr.vmem [resolvable:$true] %s102_s1 }
   0xb   :  { %79 = vmatpush.msra.mxu1 %v66_v9  ;;  %v60_v15 = vld [vmem:[%s249_s3 + $0x28] sm:$0xff]  ;;  %v59_v16 = vld [vmem:[%s249_s3 + $0x20] sm:$0xff]  ;;  %v58_v17 = vld [vmem:[%s249_s3 + $0x18] sm:$0xff] }
   0xc   :  { %v57_v18 = vld [vmem:[%s249_s3 + $0x10] sm:$0xff]  ;;  %v56_v19 = vld [vmem:[%s249_s3 + $0x8] sm:$0xff]  ;;  %v55_v20 = vld [vmem:[%s249_s3] sm:$0xff] }
   0xd   :  { %80 = vmatpush.msra.mxu1 %v65_v10  ;;  %v115_v21 = vld [vmem:[%s248_s2] ss:$0 sm:$0xff] }
   0xe   :  { %v116_v25 = vld [vmem:[%s250_s4] ss:$0 sm:$0xff] }
   0xf   :  { %81 = vmatpush.msra.mxu1 %v64_v11 }
  0x11   :  { %82 = vmatpush.msra.mxu1 %v63_v12 }
  0x13   :  { %83 = vmatpush.msra.mxu1 %v62_v13 }
  0x15   :  { %84 = vmatpush.msra.mxu1 %v61_v14 }
  0x17   :  { %85 = vmatpush.msra.mxu1 %v60_v15 }
  0x19   :  { %86 = vmatpush.msra.mxu1 %v59_v16 }
  0x1b   :  { %87 = vmatpush.msra.mxu1 %v58_v17 }
  0x1d   :  { %88 = vmatpush.msra.mxu1 %v57_v18 }
  0x1f   :  { %89 = vmatpush.msra.mxu1 %v56_v19 }
  0x21   :  { %90 = vmatpush.msra.mxu1 %v55_v20 }
  0x86   :  { %v51_v22 = vpop.f32.mrf.mxu0 }
  0x87   :  { %v52_v23 = vadd.f32 %v115_v21, %v51_v22 }
  0x89   :  { %v54_v24 = vmax.f32 %v52_v23, 0.0 }
  0x8b   :  { %91 = vmatmul.f32.vlgmr.msra.gmra.mxu1 %v54_v24 }
 0x108   :  { %v92_v26 = vpop.f32.mrf.mxu1 }
 0x109   :  { %v93_v27 = vadd.f32 %v116_v25, %v92_v26 }
 0x10b   :  { %96 = vst.msk [vmem:[#allocation2] sm:$0xff] %vm95_vm1, %v93_v27 }
 0x10c   :  { %107 = dma.vmem_to_hbm [thread:$0]  %s103_s1, 128, %s105_s14, [#allocation3]  }
 0x10d   :  { %141 = dma.done.wait [#allocation3], 128  }
 0x10e   :  { %142 = vsyncadd [#allocation3], 4294967168 }
 0x10f   :  { %112 = vsyncpa [#allocation3], 1 }

</bundles_post_ra>
